<compile_context>
chip_gen: v5e
topology: v5e:2x2
jax: 0.10.0
libtpu: 0.0.40
codegen_flags: <defaults>
</compile_context>

<pallas_src>
import math

import numpy as np
import jax
import jax.numpy as jnp
from jax.experimental import pallas as pl
from jax.experimental.pallas import tpu as pltpu


def _round_up(x, m):
    return (x + m - 1) // m * m


def _vmem_capacity_bytes():
    """Per-core VMEM capacity; conservative (v7x-sized) fallback."""
    try:
        info = pltpu.get_tpu_info()
        for name in ("vmem_capacity_bytes", "vmem_size_bytes", "vmem_bytes"):
            v = getattr(info, name, None)
            if v:
                return int(v)
    except Exception:
        pass
    return 64 * 1024 * 1024  # v7x per-core VMEM (smallest of the targets)


def _choose_tile_n(N, K, E, in_bytes, out_bytes, budget_bytes):
    """Pick the streamed-row tile from a VMEM budget.

    Per streamed row: double-buffered bf16 input + double-buffered output +
    f32 accumulator temp.  Residents (weight + bias) are charged twice in case
    single-buffering is unavailable on the running JAX.
    """
    per_row = 2 * K * in_bytes + 2 * E * out_bytes + 4 * E
    resident = 2 * (K * E * in_bytes + E * 4)
    avail = max(budget_bytes - resident, 256 * per_row)
    cap = min(8192, max(256, (avail // per_row) // 256 * 256))
    if N > cap:
        return cap
    # Small/medium N: split into >= 2 tiles so both v7x TensorCores get work,
    # keeping rows MXU-friendly (multiple of 256) when N is large enough.
    half = -(-N // 2)
    align = 256 if half >= 256 else 8
    return _round_up(half, align)


def _patch_proj_kernel(x_ref, w_ref, b_ref, o_ref):
    # x_ref: (tile_n, K) bf16 flattened patch rows (streamed over the grid)
    # w_ref: (K, E)      bf16 reshaped conv weight (constant block -> VMEM resident)
    # b_ref: (1, E)      f32  conv bias            (constant block -> VMEM resident)
    # o_ref: (tile_n, E) output tile
    acc = jnp.dot(x_ref[...], w_ref[...], preferred_element_type=jnp.float32)
    o_ref[...] = (acc + b_ref[...]).astype(o_ref.dtype)


def patch_embedding(x, weight, bias, patch_size, *,
                    compute_dtype=jnp.bfloat16, out_dtype=jnp.bfloat16):
    """x: [B, C, H, W], weight: [E, C, P, P], bias: [E].

    Returns (tokens [B, Hp*Wp, E], (Hp, Wp)), matching
    `self.proj(x).flatten(2).transpose(1, 2)` of the PyTorch module
    (operands in bf16, f32 accumulation; pass out_dtype=jnp.float32 for an
    f32 writeback).
    """
    B, C, H, W = x.shape
    P = patch_size
    E = weight.shape[0]
    assert H % P == 0 and W % P == 0, "spatial dims must be divisible by patch_size"
    Hp, Wp = H // P, W // P
    K = C * P * P
    N = B * Hp * Wp

    # --- Patchify: a single fused cast+transpose copy, no padding anywhere. ---
    patches = x.astype(compute_dtype).reshape(B, C, Hp, P, Wp, P)
    patches = jnp.transpose(patches, (0, 2, 4, 1, 3, 5)).reshape(N, K)  # rows (b,hp,wp), cols (c,kh,kw)

    w2d = weight.reshape(E, K).T.astype(compute_dtype)   # [K, E], rows ordered (c,kh,kw)
    b2d = bias.astype(jnp.float32).reshape(1, E)

    in_bytes = np.dtype(compute_dtype).itemsize
    out_bytes = np.dtype(out_dtype).itemsize
    vmem_cap = _vmem_capacity_bytes()
    tile_n = _choose_tile_n(N, K, E, in_bytes, out_bytes, int(vmem_cap * 0.6))
    grid = (pl.cdiv(N, tile_n),)

    cost = pl.CostEstimate(
        flops=2 * N * K * E,
        transcendentals=0,
        bytes_accessed=(N * K * in_bytes + K * E * in_bytes + E * 4
                        + N * E * out_bytes))

    def _call(resident_mode):
        def _resident_spec(shape):
            if resident_mode is None:
                return pl.BlockSpec(shape, lambda i: (0, 0))
            return pl.BlockSpec(shape, lambda i: (0, 0), pipeline_mode=resident_mode)

        return pl.pallas_call(
            _patch_proj_kernel,
            out_shape=jax.ShapeDtypeStruct((N, E), out_dtype),
            grid_spec=pltpu.PrefetchScalarGridSpec(
                num_scalar_prefetch=0,
                grid=grid,
                in_specs=[
                    pl.BlockSpec((tile_n, K), lambda i: (i, 0)),   # streamed patch rows
                    _resident_spec((K, E)),                        # VMEM-resident weight
                    _resident_spec((1, E)),                        # VMEM-resident bias
                ],
                out_specs=pl.BlockSpec((tile_n, E), lambda i: (i, 0)),
            ),
            compiler_params=pltpu.CompilerParams(
                dimension_semantics=("parallel",),                 # megacore sharding on v7x
                vmem_limit_bytes=int(vmem_cap * 0.85)),
            cost_estimate=cost,
        )(patches, w2d, b2d)

    try:
        # Single-buffer the constant-index residents (saves K*E*2 + E*4 VMEM).
        out = _call(pl.Buffered(1))
    except Exception:
        # Fallback if the running JAX rejects single-buffered pipeline inputs.
        out = _call(None)

    tokens = out.reshape(B, Hp * Wp, E)   # free view == flatten(2).transpose(1, 2)
    return tokens, (Hp, Wp)


def init_params(key, image_channels, embed_dim, patch_size):
    """Deterministic init matching Conv2d's kaiming-uniform scheme (shapes only)."""
    kw, kb = jax.random.split(key)
    fan_in = image_channels * patch_size * patch_size
    bound_w = math.sqrt(1.0 / fan_in) * math.sqrt(3.0)   # kaiming_uniform(a=sqrt(5))
    bound_b = 1.0 / math.sqrt(fan_in)
    weight = jax.random.uniform(
        kw, (embed_dim, image_channels, patch_size, patch_size),
        minval=-bound_w, maxval=bound_w, dtype=jnp.float32)
    bias = jax.random.uniform(
        kb, (embed_dim,), minval=-bound_b, maxval=bound_b, dtype=jnp.float32)
    return weight, bias


if __name__ == "__main__":
    key = jax.random.PRNGKey(0)
    k_x, k_p = jax.random.split(key)

    B, C, H, W = 2, 4, 16, 16
    embed_dim, patch_size = 32, 4

    x = jax.random.normal(k_x, (B, C, H, W), dtype=jnp.float32)
    weight, bias = init_params(k_p, C, embed_dim, patch_size)

    tokens, (Hp, Wp) = patch_embedding(x, weight, bias, patch_size)
    tokens = jax.block_until_ready(tokens)

    assert tokens.shape == (B, Hp * Wp, embed_dim)
    assert (Hp, Wp) == (H // patch_size, W // patch_size)

    tok_f32 = tokens.astype(jnp.float32)

    # Reference 1: bf16-operand conv with f32 accumulation (kernel's operand
    # precision); tolerance covers the bf16 output rounding of the kernel.
    ref_bf16 = jax.lax.conv_general_dilated(
        x.astype(jnp.bfloat16), weight.astype(jnp.bfloat16),
        window_strides=(patch_size, patch_size), padding="VALID",
        dimension_numbers=("NCHW", "OIHW", "NCHW"),
        preferred_element_type=jnp.float32) + bias[None, :, None, None]
    ref_bf16 = jnp.transpose(ref_bf16.reshape(B, embed_dim, Hp * Wp), (0, 2, 1))
    assert jnp.allclose(tok_f32, ref_bf16, atol=2e-2, rtol=2e-2)

    # Reference 2: full-f32 conv, loose tolerance (bf16 operand + output rounding).
    ref_f32 = jax.lax.conv_general_dilated(
        x, weight, window_strides=(patch_size, patch_size), padding="VALID",
        dimension_numbers=("NCHW", "OIHW", "NCHW")) + bias[None, :, None, None]
    ref_f32 = jnp.transpose(ref_f32.reshape(B, embed_dim, Hp * Wp), (0, 2, 1))
    assert jnp.allclose(tok_f32, ref_f32, atol=6e-2, rtol=6e-2)

    print("KERNEL_OK")
</pallas_src>

<mosaic_0001>
module attributes {stable_mosaic.version = 11 : i64} {
  func.func @_patch_proj_kernel(%arg0: i32, %arg1: memref<16x64xbf16, #tpu.memory_space<vmem>>, %arg2: memref<64x32xbf16, #tpu.memory_space<vmem>>, %arg3: memref<1x32xf32, #tpu.memory_space<vmem>>, %arg4: memref<16x32xbf16, #tpu.memory_space<vmem>>) attributes {dimension_semantics = [#tpu.dimension_semantics<parallel>], iteration_bounds = array<i64: 2>, scalar_prefetch = 0 : i64, scratch_operands = 0 : i64, tpu.core_type = #tpu.core_type<tc>, window_params = [{transform_indices = @transform_0, window_bounds = array<i64: 16, 64>}, {pipeline_mode = #tpu.pipeline_mode<synchronous>, transform_indices = @transform_1, window_bounds = array<i64: 64, 32>}, {pipeline_mode = #tpu.pipeline_mode<synchronous>, transform_indices = @transform_2, window_bounds = array<i64: 1, 32>}, {transform_indices = @transform_3, window_bounds = array<i64: 16, 32>}]} {
    %c0 = arith.constant 0 : index
    %c0_0 = arith.constant 0 : index
    %0 = vector.load %arg1[%c0, %c0_0] : memref<16x64xbf16, #tpu.memory_space<vmem>>, vector<16x64xbf16>
    %c0_1 = arith.constant 0 : index
    %c0_2 = arith.constant 0 : index
    %1 = vector.load %arg2[%c0_1, %c0_2] : memref<64x32xbf16, #tpu.memory_space<vmem>>, vector<64x32xbf16>
    %cst = arith.constant dense<0.000000e+00> : vector<16x32xf32>
    %2 = tpu.matmul %0, %1, %cst {dimension_numbers = #tpu.dot_dimension_numbers<[1], [0], [0], [1], [0, 0, 1, 1], [], []>} : vector<16x64xbf16>, vector<64x32xbf16>, vector<16x32xf32> -> vector<16x32xf32>
    %c0_3 = arith.constant 0 : index
    %c0_4 = arith.constant 0 : index
    %3 = vector.load %arg3[%c0_3, %c0_4] : memref<1x32xf32, #tpu.memory_space<vmem>>, vector<1x32xf32>
    %4 = vector.broadcast %3 : vector<1x32xf32> to vector<16x32xf32>
    %5 = arith.addf %2, %4 : vector<16x32xf32>
    %6 = arith.truncf %5 : vector<16x32xf32> to vector<16x32xbf16>
    %c0_5 = arith.constant 0 : index
    %c0_6 = arith.constant 0 : index
    %7 = vector.load %arg4[%c0_5, %c0_6] : memref<16x32xbf16, #tpu.memory_space<vmem>>, vector<16x32xbf16>
    tpu.vector_store %arg4[%c0_5, %c0_6], %6 {strides = array<i32>} : memref<16x32xbf16, #tpu.memory_space<vmem>>, vector<16x32xbf16>,
    return
  }
  func.func @transform_0(%arg0: i32) -> (i32, i32) {
    %c0_i32 = arith.constant 0 : i32
    %c0_i32_0 = arith.constant 0 : i32
    return %arg0, %c0_i32 : i32, i32
  }
  func.func @transform_1(%arg0: i32) -> (i32, i32) {
    %c0_i32 = arith.constant 0 : i32
    %c0_i32_0 = arith.constant 0 : i32
    %c0_i32_1 = arith.constant 0 : i32
    return %c0_i32, %c0_i32_0 : i32, i32
  }
  func.func @transform_2(%arg0: i32) -> (i32, i32) {
    %c0_i32 = arith.constant 0 : i32
    %c0_i32_0 = arith.constant 0 : i32
    %c0_i32_1 = arith.constant 0 : i32
    return %c0_i32, %c0_i32_0 : i32, i32
  }
  func.func @transform_3(%arg0: i32) -> (i32, i32) {
    %c0_i32 = arith.constant 0 : i32
    %c0_i32_0 = arith.constant 0 : i32
    return %arg0, %c0_i32 : i32, i32
  }
}

module attributes {stable_mosaic.version = 11 : i64} {
  func.func @_patch_proj_kernel(%arg0: i32, %arg1: memref<16x64xbf16, #tpu.memory_space<vmem>>, %arg2: memref<64x32xbf16, #tpu.memory_space<vmem>>, %arg3: memref<1x32xf32, #tpu.memory_space<vmem>>, %arg4: memref<16x32xbf16, #tpu.memory_space<vmem>>) attributes {dimension_semantics = [#tpu.dimension_semantics<parallel>], iteration_bounds = array<i64: 2>, scalar_prefetch = 0 : i64, scratch_operands = 0 : i64, tpu.core_type = #tpu.core_type<tc>, window_params = [{transform_indices = @transform_0, window_bounds = array<i64: 16, 64>}, {pipeline_mode = #tpu.pipeline_mode<synchronous>, transform_indices = @transform_1, window_bounds = array<i64: 64, 32>}, {pipeline_mode = #tpu.pipeline_mode<synchronous>, transform_indices = @transform_2, window_bounds = array<i64: 1, 32>}, {transform_indices = @transform_3, window_bounds = array<i64: 16, 32>}]} {
    %c0 = arith.constant 0 : index
    %c0_0 = arith.constant 0 : index
    %0 = vector.load %arg1[%c0, %c0_0] : memref<16x64xbf16, #tpu.memory_space<vmem>>, vector<16x64xbf16>
    %c0_1 = arith.constant 0 : index
    %c0_2 = arith.constant 0 : index
    %1 = vector.load %arg2[%c0_1, %c0_2] : memref<64x32xbf16, #tpu.memory_space<vmem>>, vector<64x32xbf16>
    %cst = arith.constant dense<0.000000e+00> : vector<16x32xf32>
    %2 = tpu.matmul %0, %1, %cst {dimension_numbers = #tpu.dot_dimension_numbers<[1], [0], [0], [1], [0, 0, 1, 1], [], []>} : vector<16x64xbf16>, vector<64x32xbf16>, vector<16x32xf32> -> vector<16x32xf32>
    %c0_3 = arith.constant 0 : index
    %c0_4 = arith.constant 0 : index
    %3 = vector.load %arg3[%c0_3, %c0_4] : memref<1x32xf32, #tpu.memory_space<vmem>>, vector<1x32xf32>
    %4 = vector.broadcast %3 : vector<1x32xf32> to vector<16x32xf32>
    %5 = arith.addf %2, %4 : vector<16x32xf32>
    %6 = arith.truncf %5 : vector<16x32xf32> to vector<16x32xbf16>
    %c0_5 = arith.constant 0 : index
    %c0_6 = arith.constant 0 : index
    %7 = vector.load %arg4[%c0_5, %c0_6] : memref<16x32xbf16, #tpu.memory_space<vmem>>, vector<16x32xbf16>
    tpu.vector_store %arg4[%c0_5, %c0_6], %6 {strides = array<i32>} : memref<16x32xbf16, #tpu.memory_space<vmem>>, vector<16x32xbf16>,
    return
  }
  func.func @transform_0(%arg0: i32) -> (i32, i32) {
    %c0_i32 = arith.constant 0 : i32
    %c0_i32_0 = arith.constant 0 : i32
    return %arg0, %c0_i32 : i32, i32
  }
  func.func @transform_1(%arg0: i32) -> (i32, i32) {
    %c0_i32 = arith.constant 0 : i32
    %c0_i32_0 = arith.constant 0 : i32
    %c0_i32_1 = arith.constant 0 : i32
    return %c0_i32, %c0_i32_0 : i32, i32
  }
  func.func @transform_2(%arg0: i32) -> (i32, i32) {
    %c0_i32 = arith.constant 0 : i32
    %c0_i32_0 = arith.constant 0 : i32
    %c0_i32_1 = arith.constant 0 : i32
    return %c0_i32, %c0_i32_0 : i32, i32
  }
  func.func @transform_3(%arg0: i32) -> (i32, i32) {
    %c0_i32 = arith.constant 0 : i32
    %c0_i32_0 = arith.constant 0 : i32
    return %arg0, %c0_i32 : i32, i32
  }
}

</mosaic_0001>

<bundles_post_ra>
// kernel: tpu_custom_call.1
= control target key start
LH: loop header
LB: loop body
LE: loop exit
PB: predicated region body
PF: predicated region fallthrough
CT: control target
= control target key end

     0   :  { %8 = vsyncpa [#allocation3], 0  ;;  %s583_s0 = inlined_call_operand.vmem [shape: bf16[32,64], index: 0, kind: input, shape index: {}]   ;;  %s584_s1 = inlined_call_operand.vmem [shape: bf16[64,32], index: 1, kind: input, shape index: {}]   ;;  %s585_s2 = inlined_call_operand.vmem [shape: f32[1,32], index: 2, kind: input, shape index: {}]   ;;  %s586_s3 = inlined_call_operand.hbm [shape: bf16[32,32], index: 3, kind: output, shape index: {}]  }
   0x1   :  { %10 = vsyncpa [#allocation3 + $0x1], 0  ;;  %s484_s12 = smov 0   ;;  %s486_s13 = smov 0  }
   0x2   :  { %s488_s14 = smov 0   ;;  %s490_s15 = smov 0  }
   0x3 LB: > { %s505_s16 = sadd.s32 4294967295, %s460_s15   ;;  %s317_s17 = sadd.s32 4294967294, %s460_s15   ;;  %s460_s15 = sphi %s490_s15, %s592_s15   ;;  %s456_s14 = sphi %s488_s14, %s591_s14   ;;  %s452_s13 = sphi %s486_s13, %s590_s13   ;;  %s448_s12 = sphi %s484_s12, %s589_s12  }
   0x4   : > { %s509_s18 = sadd.s32 1, %s460_s15   ;;  %s91_s19 = sadd.s32 1, %s456_s14 }
   0x5   : > { %s88_s20 = ssub.s32 %s460_s15, %s509_s18  ;;  %p101_p0 = scmp.ne.s32.totalorder %s456_s14, %s452_s13 }
   0x6   : > { %p89_p1 = scmp.eq.s32.totalorder %s88_s20, 0  ;;  %p102_p2 = scmp.eq.s32.totalorder %s505_s16, 1 }
   0x7   : > { %p107_p3 = scmp.ne.s32.totalorder %s452_s13, %s448_s12  ;;  %p108_p4 = scmp.eq.s32.totalorder %s317_s17, 1 }
   0x8   : > { %s520_s21 = scalar_select %p89_p1, %s456_s14, %s91_s19  }
   0x9   : > { %p522_p5 = por %p102_p2, %p101_p0  ;;  %p526_p6 = por %p108_p4, %p107_p3 }
   0xa   : > { %p320_p7 = scmp.ge.s32.totalorder %s460_s15, 1  ;;  %p141_p8 = scmp.lt.s32.totalorder %s460_s15, 3 }
   0xc   : > { %p142_p9 = pnand %p320_p7, %p141_p8 }
   0xd   : > { %s322_s26 = sshll.u32 (!%p142_p9), %s505_s16, 1  ;;  %s162_s10 = sand.u32 (!%p142_p9), 1, %s452_s13  }
   0xe   : > { %145 = sbr.rel (%p142_p9) target bundleno = 177 (0xb1), region = 32  ;;  %p166_p10 = scmp.lt.s32.totalorder (!%p142_p9), %s322_s26, 3 }
   0xf   : > { %s321_s19 = sshll.u32 (!%p142_p9), %s162_s10, 3  ;;  %s355_s20 = sshll.u32 (!%p142_p9), %s505_s16, 3 }
  0x10   : > { %s164_s27 = scalar_lea.vmem (!%p142_p9), [#allocation2], %s321_s19  ;;  %s240_s30 = scalar_lea.sflag (!%p142_p9), [#allocation3], %s162_s10 }
  0x11   : > { %s252_s28 = sshll.u32 (!%p142_p9), %s164_s27, 4  ;;  %s418_s7 = scalar_lea.hbm (!%p142_p9), %s586_s3, 16  ;;  %s253_s28 = int_to_ptr.vmem [resolvable:$true] %s252_s28 }
  0x13   : > { %v354_v0 = vld [vmem:[%s584_s1 + $0x18] sm:$0xff]  ;;  %v353_v1 = vld [vmem:[%s584_s1 + $0x10] sm:$0xff]  ;;  %s594_s26 = smov (!%p166_p10, %s322_s26), 3  ;;  %v352_v2 = vld [vmem:[%s584_s1 + $0x8] sm:$0xff]  ;;  %vm216_vm0 = vcmask 523264   ;;  %vm236_vm1 = vcmask 257024  }
  0x14   : > { %224 = vmatpush.bf16.msra.mxu0 %v354_v0  ;;  %s323_s4 = sshll.u32 %s594_s26, 2  ;;  %v351_v3 = vld [vmem:[%s584_s1] sm:$0xff]  ;;  %s251_s26 = scalar_lea.hbm %s586_s3, %s355_s20 }
  0x15   : > { %s169_s9 = scalar_lea.vmem %s583_s0, %s323_s4  ;;  %v397_v5 = vld [vmem:[%s585_s2] ss:$0 sm:$0xff]  ;;  %s254_s29 = sshll.u32 %s251_s26, 4  ;;  %s255_s29 = int_to_ptr.hbm [resolvable:$true] %s254_s29 }
  0x16   : > { %v350_v4 = vld [vmem:[%s169_s9] sm:$0xff]  ;;  %s412_s4 = sshra.s32 %s255_s29, 4  ;;  %s413_s4 = int_to_ptr.hbm [resolvable:$true] %s412_s4 }
  0x17   : > { %s414_s16 = scalar_lea.hbm %s413_s4, 8  ;;  %p419_p0 = scmp.lt.s32.totalorder %s413_s4, %s586_s3 }
  0x18   : > { %225 = vmatpush.bf16.msra.mxu0 %v353_v1  ;;  %p415_p11 = scmp.ne.s32.totalorder %s413_s4, %s414_s16  ;;  %p420_p1 = scmp.lt.s32.totalorder %s418_s7, %s414_s16 }
  0x1a   : > { %p416_p12 = pnand %p415_p11, %p522_p5  ;;  %p421_p2 = por %p420_p1, %p419_p0 }
  0x1c   : > { %226 = vmatpush.bf16.msra.mxu0 %v352_v2  ;;  %p417_p13 = pneg %p416_p12 }
  0x1e   : > { %p422_p3 = pnand %p421_p2, %p417_p13 }
  0x20   : > { %227 = vmatpush.bf16.msra.mxu0 %v351_v3 }
  0x23   : > { %344 = vmatmul.msk.bf16.vlgmr.msra.gmra.mxu0 %vm216_vm0, %v350_v4 }
  0xa0   : > { %v229_v6 = vpop.f32.mrf.mxu0 }
  0xa1   : > { %v230_v7 = vadd.f32 %v397_v5, %v229_v6 }
  0xa3   : > { %v234_v8 = vpack.c.bf16 %v230_v7, %v230_v7 }
  0xa5   : > { %237 = vst.msk [vmem:[%s164_s27] sm:$0xf] %vm236_vm1, %v234_v8 }
  0xa8   : > { %v231_v9 = vpop.f32.mrf.mxu0 }
  0xa9   : > { %v232_v10 = vadd.f32 %v397_v5, %v231_v9 }
  0xab   : > { %v235_v11 = vpack.c.bf16 %v232_v10, %v232_v10 }
  0xad   : > { %238 = vst.msk [vmem:[%s164_s27 + $0x4] sm:$0xf] %vm236_vm1, %v235_v11 }
  0xae   : > { %425 = shalt.err (!%p422_p3)
}
  0xaf   : > { %s462_s10 = smov 64   ;;  %s463_s11 = smov 4  }
  0xb0   : > { %356 = dma.vmem_to_hbm [thread:$0]  (%p522_p5), %s253_s28, 128, %s255_s29, %s240_s30, %s462_s10, %s462_s10, %s463_s11  }
  0xb1 PF: > { %p362_p4 = scmp.ge.s32.totalorder %s460_s15, 2  ;;  %s269_s17 = sand.u32 1, %s448_s12  }
  0xb2   : > { %s270_s19 = scalar_lea.sflag [#allocation3], %s269_s17 }
  0xb3   : > { %p359_p7 = pnand %p362_p4, %p526_p6 }
  0xb5   : > { %p360_p8 = pneg %p359_p7 }
  0xb7   : > { %443 = dma.done.wait (%p360_p8), %s270_s19, 128  }
  0xb8   : > { %445 = vsyncadd (%p360_p8), %s270_s19, 4294967168  ;;  %p13_p9 = scmp.ge.s32.totalorder %s509_s18, 4   ;;  %s589_s12 = smov %s452_s13 }
  0xb9   : > { %s590_s13 = smov %s456_s14  ;;  %s591_s14 = smov %s520_s21 }
  0xba   : > { %s592_s15 = smov %s509_s18  ;;  %15 = sbr.rel (!%p13_p9) target bundleno = 3 (0x3), region = 67 }
  0xbf   :  { %276 = vsyncpa [#allocation3], 1 }
  0xc0   :  { %278 = vsyncpa [#allocation3 + $0x1], 1 }

// kernel: tpu_custom_call.1
= control target key start
LH: loop header
LB: loop body
LE: loop exit
PB: predicated region body
PF: predicated region fallthrough
CT: control target
= control target key end

     0   :  { %8 = vsyncpa [#allocation3], 0  ;;  %s583_s0 = inlined_call_operand.vmem [shape: bf16[32,64], index: 0, kind: input, shape index: {}]   ;;  %s584_s1 = inlined_call_operand.vmem [shape: bf16[64,32], index: 1, kind: input, shape index: {}]   ;;  %s585_s2 = inlined_call_operand.vmem [shape: f32[1,32], index: 2, kind: input, shape index: {}]   ;;  %s586_s3 = inlined_call_operand.hbm [shape: bf16[32,32], index: 3, kind: output, shape index: {}]  }
   0x1   :  { %10 = vsyncpa [#allocation3 + $0x1], 0  ;;  %s484_s12 = smov 0   ;;  %s486_s13 = smov 0  }
   0x2   :  { %s488_s14 = smov 0   ;;  %s490_s15 = smov 0  }
   0x3 LB: > { %s505_s16 = sadd.s32 4294967295, %s460_s15   ;;  %s317_s17 = sadd.s32 4294967294, %s460_s15   ;;  %s460_s15 = sphi %s490_s15, %s592_s15   ;;  %s456_s14 = sphi %s488_s14, %s591_s14   ;;  %s452_s13 = sphi %s486_s13, %s590_s13   ;;  %s448_s12 = sphi %s484_s12, %s589_s12  }
   0x4   : > { %s509_s18 = sadd.s32 1, %s460_s15   ;;  %s91_s19 = sadd.s32 1, %s456_s14 }
   0x5   : > { %s88_s20 = ssub.s32 %s460_s15, %s509_s18  ;;  %p101_p0 = scmp.ne.s32.totalorder %s456_s14, %s452_s13 }
   0x6   : > { %p89_p1 = scmp.eq.s32.totalorder %s88_s20, 0  ;;  %p102_p2 = scmp.eq.s32.totalorder %s505_s16, 1 }
   0x7   : > { %p107_p3 = scmp.ne.s32.totalorder %s452_s13, %s448_s12  ;;  %p108_p4 = scmp.eq.s32.totalorder %s317_s17, 1 }
   0x8   : > { %s520_s21 = scalar_select %p89_p1, %s456_s14, %s91_s19  }
   0x9   : > { %p522_p5 = por %p102_p2, %p101_p0  ;;  %p526_p6 = por %p108_p4, %p107_p3 }
   0xa   : > { %p320_p7 = scmp.ge.s32.totalorder %s460_s15, 1  ;;  %p141_p8 = scmp.lt.s32.totalorder %s460_s15, 3 }
   0xc   : > { %p142_p9 = pnand %p320_p7, %p141_p8 }
   0xd   : > { %s322_s26 = sshll.u32 (!%p142_p9), %s505_s16, 1  ;;  %s162_s10 = sand.u32 (!%p142_p9), 1, %s452_s13  }
   0xe   : > { %145 = sbr.rel (%p142_p9) target bundleno = 177 (0xb1), region = 32  ;;  %p166_p10 = scmp.lt.s32.totalorder (!%p142_p9), %s322_s26, 3 }
   0xf   : > { %s321_s19 = sshll.u32 (!%p142_p9), %s162_s10, 3  ;;  %s355_s20 = sshll.u32 (!%p142_p9), %s505_s16, 3 }
  0x10   : > { %s164_s27 = scalar_lea.vmem (!%p142_p9), [#allocation2], %s321_s19  ;;  %s240_s30 = scalar_lea.sflag (!%p142_p9), [#allocation3], %s162_s10 }
  0x11   : > { %s252_s28 = sshll.u32 (!%p142_p9), %s164_s27, 4  ;;  %s418_s7 = scalar_lea.hbm (!%p142_p9), %s586_s3, 16  ;;  %s253_s28 = int_to_ptr.vmem [resolvable:$true] %s252_s28 }
  0x13   : > { %v354_v0 = vld [vmem:[%s584_s1 + $0x18] sm:$0xff]  ;;  %v353_v1 = vld [vmem:[%s584_s1 + $0x10] sm:$0xff]  ;;  %s594_s26 = smov (!%p166_p10, %s322_s26), 3  ;;  %v352_v2 = vld [vmem:[%s584_s1 + $0x8] sm:$0xff]  ;;  %vm216_vm0 = vcmask 523264   ;;  %vm236_vm1 = vcmask 257024  }
  0x14   : > { %224 = vmatpush.bf16.msra.mxu0 %v354_v0  ;;  %s323_s4 = sshll.u32 %s594_s26, 2  ;;  %v351_v3 = vld [vmem:[%s584_s1] sm:$0xff]  ;;  %s251_s26 = scalar_lea.hbm %s586_s3, %s355_s20 }
  0x15   : > { %s169_s9 = scalar_lea.vmem %s583_s0, %s323_s4  ;;  %v397_v5 = vld [vmem:[%s585_s2] ss:$0 sm:$0xff]  ;;  %s254_s29 = sshll.u32 %s251_s26, 4  ;;  %s255_s29 = int_to_ptr.hbm [resolvable:$true] %s254_s29 }
  0x16   : > { %v350_v4 = vld [vmem:[%s169_s9] sm:$0xff]  ;;  %s412_s4 = sshra.s32 %s255_s29, 4  ;;  %s413_s4 = int_to_ptr.hbm [resolvable:$true] %s412_s4 }
  0x17   : > { %s414_s16 = scalar_lea.hbm %s413_s4, 8  ;;  %p419_p0 = scmp.lt.s32.totalorder %s413_s4, %s586_s3 }
  0x18   : > { %225 = vmatpush.bf16.msra.mxu0 %v353_v1  ;;  %p415_p11 = scmp.ne.s32.totalorder %s413_s4, %s414_s16  ;;  %p420_p1 = scmp.lt.s32.totalorder %s418_s7, %s414_s16 }
  0x1a   : > { %p416_p12 = pnand %p415_p11, %p522_p5  ;;  %p421_p2 = por %p420_p1, %p419_p0 }
  0x1c   : > { %226 = vmatpush.bf16.msra.mxu0 %v352_v2  ;;  %p417_p13 = pneg %p416_p12 }
  0x1e   : > { %p422_p3 = pnand %p421_p2, %p417_p13 }
  0x20   : > { %227 = vmatpush.bf16.msra.mxu0 %v351_v3 }
  0x23   : > { %344 = vmatmul.msk.bf16.vlgmr.msra.gmra.mxu0 %vm216_vm0, %v350_v4 }
  0xa0   : > { %v229_v6 = vpop.f32.mrf.mxu0 }
  0xa1   : > { %v230_v7 = vadd.f32 %v397_v5, %v229_v6 }
  0xa3   : > { %v234_v8 = vpack.c.bf16 %v230_v7, %v230_v7 }
  0xa5   : > { %237 = vst.msk [vmem:[%s164_s27] sm:$0xf] %vm236_vm1, %v234_v8 }
  0xa8   : > { %v231_v9 = vpop.f32.mrf.mxu0 }
  0xa9   : > { %v232_v10 = vadd.f32 %v397_v5, %v231_v9 }
  0xab   : > { %v235_v11 = vpack.c.bf16 %v232_v10, %v232_v10 }
  0xad   : > { %238 = vst.msk [vmem:[%s164_s27 + $0x4] sm:$0xf] %vm236_vm1, %v235_v11 }
  0xae   : > { %425 = shalt.err (!%p422_p3)
}
  0xaf   : > { %s462_s10 = smov 64   ;;  %s463_s11 = smov 4  }
  0xb0   : > { %356 = dma.vmem_to_hbm [thread:$0]  (%p522_p5), %s253_s28, 128, %s255_s29, %s240_s30, %s462_s10, %s462_s10, %s463_s11  }
  0xb1 PF: > { %p362_p4 = scmp.ge.s32.totalorder %s460_s15, 2  ;;  %s269_s17 = sand.u32 1, %s448_s12  }
  0xb2   : > { %s270_s19 = scalar_lea.sflag [#allocation3], %s269_s17 }
  0xb3   : > { %p359_p7 = pnand %p362_p4, %p526_p6 }
  0xb5   : > { %p360_p8 = pneg %p359_p7 }
  0xb7   : > { %443 = dma.done.wait (%p360_p8), %s270_s19, 128  }
  0xb8   : > { %445 = vsyncadd (%p360_p8), %s270_s19, 4294967168  ;;  %p13_p9 = scmp.ge.s32.totalorder %s509_s18, 4   ;;  %s589_s12 = smov %s452_s13 }
  0xb9   : > { %s590_s13 = smov %s456_s14  ;;  %s591_s14 = smov %s520_s21 }
  0xba   : > { %s592_s15 = smov %s509_s18  ;;  %15 = sbr.rel (!%p13_p9) target bundleno = 3 (0x3), region = 67 }
  0xbf   :  { %276 = vsyncpa [#allocation3], 1 }
  0xc0   :  { %278 = vsyncpa [#allocation3 + $0x1], 1 }

</bundles_post_ra>
